<compile_context>
chip_gen: v5e
topology: v5e:2x2
jax: 0.10.0
libtpu: 0.0.40
codegen_flags: <defaults>
</compile_context>

<pallas_src>
import functools

import jax
import jax.numpy as jnp
from jax.experimental import pallas as pl
from jax.experimental.pallas import tpu as pltpu


# ---------------------------------------------------------------------------
# Model hyper-parameters (small, consistent with the module's __init__)
# ---------------------------------------------------------------------------
NUM_DISEASES      = 8
NUM_MIRNAS        = 8
N_NODES           = NUM_DISEASES + NUM_MIRNAS
FEAT_DIM          = 16          # d_sim_dim == m_sim_dim (shared node feature dim)
FEATURE_ATTN_SIZE = 16
NUM_HEADS         = 4
OUT_DIM           = 32
NUM_LAYERS        = 2
SLOPE             = 0.2
BATCH             = 8           # number of (mirna, disease) samples


# ---------------------------------------------------------------------------
# Constant-slab layout (all bands start at sublane multiples of 8, lane off 0)
# ---------------------------------------------------------------------------
def _pad8(n):
    return -(-n // 8) * 8

HF_IN  = NUM_HEADS * FEAT_DIM               # 64
HF_OUT = NUM_HEADS * FEATURE_ATTN_SIZE      # 64

ROW_WBLK  = 0                                # (HF_IN, HF_OUT)  block-diag GAT proj
ROW_WMD   = ROW_WBLK + _pad8(HF_IN)          # (HF_OUT, 2*OUT)  [wm_fold | wd_fold]
ROW_MSRC  = ROW_WMD + _pad8(HF_OUT)          # (F_in, H)        folded a_src
ROW_MDST  = ROW_MSRC + _pad8(FEAT_DIM)       # (H, F_in)        folded a_dst (transposed)
ROW_W2    = ROW_MDST + _pad8(NUM_HEADS)      # (OUT, OUT//2)
ROW_W3    = ROW_W2 + _pad8(OUT_DIM)          # (OUT//2, 1)
ROW_BF    = ROW_W3 + _pad8(OUT_DIM // 2)     # (1, OUT)         folded NCF layer-1 bias
ROW_B2    = ROW_BF + 8                       # (1, OUT//2)
ROW_B3    = ROW_B2 + 8                       # (1, 1)
SLAB_ROWS = ROW_B3 + 8                       # 224
SLAB_COLS = max(HF_OUT, 2 * OUT_DIM)         # 64

# packed graph slab: [x ; x.T ; adj_bias tiled over heads]
ROW_X     = 0
ROW_XT    = N_NODES
ROW_ADJ   = 2 * N_NODES
XG_ROWS   = 2 * N_NODES + NUM_HEADS * N_NODES   # 96


def _vmem():
    return pl.BlockSpec(memory_space=pltpu.MemorySpace.VMEM)


# ---------------------------------------------------------------------------
# The single fused kernel
# ---------------------------------------------------------------------------
def ancnmda_kernel(samp_ref, xg_ref, slab_ref, o_ref, *,
                   num_heads, attn_size, feat_dim, slope,
                   num_diseases, num_nodes, out_dim):
    n, nh = num_nodes, num_heads

    # ---- unpack the two input slabs (static, sublane-aligned views) --------
    x    = xg_ref[ROW_X:ROW_X + n, :]                       # (N, F_in)
    x_t  = xg_ref[ROW_XT:ROW_XT + feat_dim, :]              # (F_in, N)
    adj4 = xg_ref[ROW_ADJ:ROW_ADJ + nh * n, :]              # (H*N, N) additive 0/-1e30

    w_blk  = slab_ref[ROW_WBLK:ROW_WBLK + nh * feat_dim, :]              # (H*F_in, H*F)
    w_md   = slab_ref[ROW_WMD:ROW_WMD + nh * attn_size, :]               # (H*F, 2*out)
    m_src  = slab_ref[ROW_MSRC:ROW_MSRC + feat_dim, 0:nh]                # (F_in, H)
    m_dstT = slab_ref[ROW_MDST:ROW_MDST + nh, 0:feat_dim]                # (H, F_in)
    w2     = slab_ref[ROW_W2:ROW_W2 + out_dim, 0:out_dim // 2]           # (out, out//2)
    w3     = slab_ref[ROW_W3:ROW_W3 + out_dim // 2, 0:1]                 # (out//2, 1)
    bf     = slab_ref[ROW_BF:ROW_BF + 1, 0:out_dim]                      # (1, out)
    b2     = slab_ref[ROW_B2:ROW_B2 + 1, 0:out_dim // 2]                 # (1, out//2)
    b3     = slab_ref[ROW_B3:ROW_B3 + 1, 0:1]                            # (1, 1)

    # ---- multi-head GAT: attention scores (2 matmuls, no in-kernel transpose)
    e_src  = jnp.dot(x, m_src, preferred_element_type=jnp.float32)       # (N, H)
    e_dstT = jnp.dot(m_dstT, x_t, preferred_element_type=jnp.float32)    # (H, N)

    # Head-stacked logits: rows [h*N, (h+1)*N) belong to head h.  Only the
    # tiny (16,1)+(1,16) broadcast-add is per head; everything downstream of
    # it is a single batched pass over all heads.
    e_ss = jnp.concatenate(
        [e_src[:, h:h + 1] + e_dstT[h:h + 1, :] for h in range(nh)],
        axis=0)                                                           # (H*N, N)
    e_ss = jnp.where(e_ss > 0, e_ss, slope * e_ss)                        # LeakyReLU
    e_ss = e_ss + adj4                                                    # mask non-edges
    mrow = jnp.max(e_ss, axis=1, keepdims=True)
    p = jnp.exp(e_ss - mrow)
    attn_ss = p * pl.reciprocal(jnp.sum(p, axis=1, keepdims=True), approx=True)

    # ---- aggregation via associativity: agg_h = (attn_h @ x) @ W_h ---------
    pre = jnp.dot(attn_ss, x, preferred_element_type=jnp.float32)        # (H*N, F_in)
    # sublane-stacked -> lane-stacked (static slices + concat; rides the XLU)
    pre_l = jnp.concatenate([pre[h * n:(h + 1) * n, :] for h in range(nh)],
                            axis=1)                                       # (N, H*F_in)
    agg = jnp.dot(pre_l, w_blk, preferred_element_type=jnp.float32)      # (N, H*F)
    agg = jnp.where(agg > 0, agg,
                    jnp.exp(jnp.minimum(agg, 0.0)) - 1.0)                 # ELU (safe)

    # ---- m_f / d_f folded through NCF layer 1: both halves in ONE matmul ---
    pmd = jnp.dot(agg, w_md, preferred_element_type=jnp.float32)         # (N, 2*out)

    # ---- in-kernel sample gather: one-hot matmuls (stays vectorized) -------
    samples = samp_ref[...]                                               # (B, 2) int32
    b = samples.shape[0]
    col = jax.lax.broadcasted_iota(jnp.int32, (b, n), 1)
    sel_m = (col == samples[:, 0:1] - 1 + num_diseases).astype(jnp.float32)
    sel_d = (col == samples[:, 1:2] - 1).astype(jnp.float32)

    # ---- NCF MLP head + sigmoid --------------------------------------------
    h1 = (jnp.dot(sel_m, pmd[:, 0:out_dim], preferred_element_type=jnp.float32)
          + jnp.dot(sel_d, pmd[:, out_dim:2 * out_dim],
                    preferred_element_type=jnp.float32)
          + bf)
    h1 = jnp.maximum(h1, 0.0)
    h2 = jnp.maximum(
        jnp.dot(h1, w2, preferred_element_type=jnp.float32) + b2, 0.0)
    logit = jnp.dot(h2, w3, preferred_element_type=jnp.float32) + b3
    o_ref[...] = pl.reciprocal(1.0 + jnp.exp(-logit), approx=True)        # F.sigmoid


# ---------------------------------------------------------------------------
# Full ANCNMDA forward: host-side weight folding / packing + ONE pallas_call
# ---------------------------------------------------------------------------
def ancnmda_forward(params, x, adj, samples):
    f_in = x.shape[1]
    nh, fa = NUM_HEADS, FEATURE_ATTN_SIZE
    w = params["gat_w"]                                          # (H, F_in, F)

    # attention vectors folded through the per-head projection
    m_src  = jnp.einsum("hf,hif->ih", params["gat_a_src"], w)    # (F_in, H)
    m_dstT = jnp.einsum("hf,hif->hi", params["gat_a_dst"], w)    # (H, F_in)

    # block-diagonal projection used after the (attn @ x) matmul
    w_blk = jnp.zeros((nh * f_in, nh * fa), jnp.float32)
    for h in range(nh):
        w_blk = w_blk.at[h * f_in:(h + 1) * f_in, h * fa:(h + 1) * fa].set(w[h])

    # m_f/d_f have no nonlinearity before NCF's first layer -> fold them in,
    # and lane-concat the two halves so the kernel needs one matmul.
    w1_top = params["w1"][:OUT_DIM]
    w1_bot = params["w1"][OUT_DIM:]
    w_md = jnp.concatenate([params["wm"] @ w1_top, params["wd"] @ w1_bot], axis=1)
    bf = params["bm"] @ w1_top + params["bd"] @ w1_bot + params["b1"]    # (1, OUT)

    # ---- pack all constants into ONE lane-padded slab (single DMA) ---------
    slab = jnp.zeros((SLAB_ROWS, SLAB_COLS), jnp.float32)
    slab = slab.at[ROW_WBLK:ROW_WBLK + nh * f_in, :nh * fa].set(w_blk)
    slab = slab.at[ROW_WMD:ROW_WMD + nh * fa, :2 * OUT_DIM].set(w_md)
    slab = slab.at[ROW_MSRC:ROW_MSRC + f_in, :nh].set(m_src)
    slab = slab.at[ROW_MDST:ROW_MDST + nh, :f_in].set(m_dstT)
    slab = slab.at[ROW_W2:ROW_W2 + OUT_DIM, :OUT_DIM // 2].set(params["w2"])
    slab = slab.at[ROW_W3:ROW_W3 + OUT_DIM // 2, :1].set(params["w3"])
    slab = slab.at[ROW_BF, :OUT_DIM].set(bf[0])
    slab = slab.at[ROW_B2, :OUT_DIM // 2].set(params["b2"][0])
    slab = slab.at[ROW_B3, :1].set(params["b3"][0])

    # ---- pack graph inputs: x, x.T and the head-tiled additive adjacency ---
    adj_bias = jnp.where(adj > 0, 0.0, -1e30).astype(jnp.float32)
    xg = jnp.concatenate([x, x.T, jnp.tile(adj_bias, (nh, 1))], axis=0)  # (96, 16)

    kern = functools.partial(
        ancnmda_kernel, num_heads=nh, attn_size=fa, feat_dim=f_in,
        slope=SLOPE, num_diseases=NUM_DISEASES, num_nodes=N_NODES,
        out_dim=OUT_DIM)
    # TODO(synk): when batching many graphs / large sample batches, add a
    # leading "parallel" grid axis so v7x's second TensorCore is also used,
    # and switch to a lane-dense (B, 128) output block.
    return pl.pallas_call(
        kern,
        out_shape=jax.ShapeDtypeStruct((samples.shape[0], 1), jnp.float32),
        in_specs=[_vmem(), _vmem(), _vmem()],
        out_specs=_vmem(),
    )(samples.astype(jnp.int32), xg, slab)


# ---------------------------------------------------------------------------
# Plain-JAX reference (unfused, per-head, explicit concat / gather)
# ---------------------------------------------------------------------------
def ancnmda_reference(params, x, adj, samples):
    heads = []
    for h in range(NUM_HEADS):
        xp = x @ params["gat_w"][h]
        es = xp @ params["gat_a_src"][h][:, None]
        ed = xp @ params["gat_a_dst"][h][:, None]
        e = es + ed.T
        e = jnp.where(e > 0, e, SLOPE * e)
        logits = jnp.where(adj > 0, e, -1e30)
        attn = jax.nn.softmax(logits, axis=1)
        heads.append(jax.nn.elu(attn @ xp))
    h_agg = jnp.concatenate(heads, axis=1)
    disease_0 = h_agg[:NUM_DISEASES]
    mirna_0 = h_agg[NUM_DISEASES:NUM_DISEASES + NUM_MIRNAS]
    disease_1 = disease_0 @ params["wd"] + params["bd"]
    mirna_1 = mirna_0 @ params["wm"] + params["bm"]
    z = jnp.concatenate([mirna_1[samples[:, 0] - 1],
                         disease_1[samples[:, 1] - 1]], axis=1)
    h1 = jax.nn.relu(z @ params["w1"] + params["b1"])
    h2 = jax.nn.relu(h1 @ params["w2"] + params["b2"])
    return jax.nn.sigmoid(h2 @ params["w3"] + params["b3"])


# ---------------------------------------------------------------------------
# Deterministic parameter / input construction
# ---------------------------------------------------------------------------
def init_params(key):
    hf = NUM_HEADS * FEATURE_ATTN_SIZE
    ks = jax.random.split(key, 16)

    def xavier(k, shape):
        fan_in, fan_out = shape[-2], shape[-1]
        std = (2.0 / (fan_in + fan_out)) ** 0.5
        return std * jax.random.normal(k, shape, jnp.float32)

    return {
        # GAT: per-head projection + attention vectors
        "gat_w":     xavier(ks[0], (NUM_HEADS, FEAT_DIM, FEATURE_ATTN_SIZE)),
        "gat_a_src": 0.1 * jax.random.normal(ks[1], (NUM_HEADS, FEATURE_ATTN_SIZE), jnp.float32),
        "gat_a_dst": 0.1 * jax.random.normal(ks[2], (NUM_HEADS, FEATURE_ATTN_SIZE), jnp.float32),
        # m_f / d_f linear layers (weights stored as (in, out))
        "wm": xavier(ks[3], (hf, OUT_DIM)),
        "bm": jnp.zeros((1, OUT_DIM), jnp.float32),
        "wd": xavier(ks[4], (hf, OUT_DIM)),
        "bd": jnp.zeros((1, OUT_DIM), jnp.float32),
        # NCF MLP: 2*out -> out -> out//2 -> 1   (num_layers = 2 hidden layers)
        "w1": xavier(ks[5], (2 * OUT_DIM, OUT_DIM)),
        "b1": jnp.zeros((1, OUT_DIM), jnp.float32),
        "w2": xavier(ks[6], (OUT_DIM, OUT_DIM // 2)),
        "b2": jnp.zeros((1, OUT_DIM // 2), jnp.float32),
        "w3": xavier(ks[7], (OUT_DIM // 2, 1)),
        "b3": jnp.zeros((1, 1), jnp.float32),
    }


def build_graph(key):
    k1, k2 = jax.random.split(key)
    # node features: diseases first, then miRNAs
    x = jax.random.normal(k1, (N_NODES, FEAT_DIM), jnp.float32)
    # synthetic bipartite disease<->miRNA associations + self loops (the GAT
    # masked softmax relies on every node having at least one edge).
    assoc = (jax.random.uniform(k2, (NUM_DISEASES, NUM_MIRNAS)) < 0.4).astype(jnp.float32)
    top = jnp.concatenate([jnp.zeros((NUM_DISEASES, NUM_DISEASES)), assoc], axis=1)
    bot = jnp.concatenate([assoc.T, jnp.zeros((NUM_MIRNAS, NUM_MIRNAS))], axis=1)
    adj = jnp.concatenate([top, bot], axis=0) + jnp.eye(N_NODES, dtype=jnp.float32)
    return x, adj


if __name__ == "__main__":
    key = jax.random.PRNGKey(0)
    k_param, k_graph, k_m, k_d = jax.random.split(key, 4)

    params = init_params(k_param)
    x, adj = build_graph(k_graph)

    # samples[:, 0] in [1, num_mirnas], samples[:, 1] in [1, num_diseases]
    samples = jnp.stack(
        [jax.random.randint(k_m, (BATCH,), 1, NUM_MIRNAS + 1),
         jax.random.randint(k_d, (BATCH,), 1, NUM_DISEASES + 1)],
        axis=1).astype(jnp.int32)

    # TODO(synk): GMF and MLP submodules are constructed in __init__ but never
    # used in forward(); they are intentionally not implemented.
    out = jax.jit(ancnmda_forward)(params, x, adj, samples)
    out = jax.block_until_ready(out)

    ref = ancnmda_reference(params, x, adj, samples)

    assert out.shape == (BATCH, 1)
    assert bool(jnp.all(jnp.isfinite(out)))
    assert bool(jnp.all((out >= 0.0) & (out <= 1.0)))
    # tolerance bounded by the EUP approximate reciprocals + f32 re-association
    # from the host-side weight folding (tightened from 2e-2).
    assert bool(jnp.allclose(out, ref, atol=5e-3, rtol=5e-3))
    print("KERNEL_OK")
</pallas_src>

<mosaic_0001>
module attributes {stable_mosaic.version = 11 : i64} {
  func.func @ancnmda_kernel(%arg0: memref<8x2xi32, #tpu.memory_space<vmem>>, %arg1: memref<96x16xf32, #tpu.memory_space<vmem>>, %arg2: memref<224x64xf32, #tpu.memory_space<vmem>>, %arg3: memref<8x1xf32, #tpu.memory_space<vmem>>) attributes {dimension_semantics = [], scalar_prefetch = 0 : i64, scratch_operands = 0 : i64, tpu.core_type = #tpu.core_type<tc>} {
    %c0 = arith.constant 0 : index
    %c0_0 = arith.constant 0 : index
    %0 = vector.load %arg1[%c0, %c0_0] : memref<96x16xf32, #tpu.memory_space<vmem>>, vector<16x16xf32>
    %c16 = arith.constant 16 : index
    %c0_1 = arith.constant 0 : index
    %1 = vector.load %arg1[%c16, %c0_1] : memref<96x16xf32, #tpu.memory_space<vmem>>, vector<16x16xf32>
    %c32 = arith.constant 32 : index
    %c0_2 = arith.constant 0 : index
    %2 = vector.load %arg1[%c32, %c0_2] : memref<96x16xf32, #tpu.memory_space<vmem>>, vector<64x16xf32>
    %c0_3 = arith.constant 0 : index
    %c0_4 = arith.constant 0 : index
    %3 = vector.load %arg2[%c0_3, %c0_4] : memref<224x64xf32, #tpu.memory_space<vmem>>, vector<64x64xf32>
    %c64 = arith.constant 64 : index
    %c0_5 = arith.constant 0 : index
    %4 = vector.load %arg2[%c64, %c0_5] : memref<224x64xf32, #tpu.memory_space<vmem>>, vector<64x64xf32>
    %c128 = arith.constant 128 : index
    %c0_6 = arith.constant 0 : index
    %5 = vector.load %arg2[%c128, %c0_6] : memref<224x64xf32, #tpu.memory_space<vmem>>, vector<16x4xf32>
    %c144 = arith.constant 144 : index
    %c0_7 = arith.constant 0 : index
    %6 = vector.load %arg2[%c144, %c0_7] : memref<224x64xf32, #tpu.memory_space<vmem>>, vector<4x16xf32>
    %c152 = arith.constant 152 : index
    %c0_8 = arith.constant 0 : index
    %7 = vector.load %arg2[%c152, %c0_8] : memref<224x64xf32, #tpu.memory_space<vmem>>, vector<32x16xf32>
    %c184 = arith.constant 184 : index
    %c0_9 = arith.constant 0 : index
    %8 = vector.load %arg2[%c184, %c0_9] : memref<224x64xf32, #tpu.memory_space<vmem>>, vector<16x1xf32>
    %c200 = arith.constant 200 : index
    %c0_10 = arith.constant 0 : index
    %9 = vector.load %arg2[%c200, %c0_10] : memref<224x64xf32, #tpu.memory_space<vmem>>, vector<1x32xf32>
    %c208 = arith.constant 208 : index
    %c0_11 = arith.constant 0 : index
    %10 = vector.load %arg2[%c208, %c0_11] : memref<224x64xf32, #tpu.memory_space<vmem>>, vector<1x16xf32>
    %c216 = arith.constant 216 : index
    %c0_12 = arith.constant 0 : index
    %11 = vector.load %arg2[%c216, %c0_12] : memref<224x64xf32, #tpu.memory_space<vmem>>, vector<1x1xf32>
    %cst = arith.constant dense<0.000000e+00> : vector<16x4xf32>
    %12 = tpu.matmul %0, %5, %cst {dimension_numbers = #tpu.dot_dimension_numbers<[1], [0], [0], [1], [0, 0, 1, 1], [], []>} : vector<16x16xf32>, vector<16x4xf32>, vector<16x4xf32> -> vector<16x4xf32>
    %cst_13 = arith.constant dense<0.000000e+00> : vector<4x16xf32>
    %13 = tpu.matmul %6, %1, %cst_13 {dimension_numbers = #tpu.dot_dimension_numbers<[1], [0], [0], [1], [0, 0, 1, 1], [], []>} : vector<4x16xf32>, vector<16x16xf32>, vector<4x16xf32> -> vector<4x16xf32>
    %14 = vector.extract_strided_slice %12 {offsets = [0, 0], sizes = [16, 1], strides = [1, 1]} : vector<16x4xf32> to vector<16x1xf32>
    %15 = vector.extract_strided_slice %13 {offsets = [0, 0], sizes = [1, 16], strides = [1, 1]} : vector<4x16xf32> to vector<1x16xf32>
    %16 = vector.broadcast %14 : vector<16x1xf32> to vector<16x16xf32>
    %17 = vector.broadcast %15 : vector<1x16xf32> to vector<16x16xf32>
    %18 = arith.addf %16, %17 : vector<16x16xf32>
    %19 = vector.extract_strided_slice %12 {offsets = [0, 1], sizes = [16, 1], strides = [1, 1]} : vector<16x4xf32> to vector<16x1xf32>
    %20 = vector.extract_strided_slice %13 {offsets = [1, 0], sizes = [1, 16], strides = [1, 1]} : vector<4x16xf32> to vector<1x16xf32>
    %21 = vector.broadcast %19 : vector<16x1xf32> to vector<16x16xf32>
    %22 = vector.broadcast %20 : vector<1x16xf32> to vector<16x16xf32>
    %23 = arith.addf %21, %22 : vector<16x16xf32>
    %24 = vector.extract_strided_slice %12 {offsets = [0, 2], sizes = [16, 1], strides = [1, 1]} : vector<16x4xf32> to vector<16x1xf32>
    %25 = vector.extract_strided_slice %13 {offsets = [2, 0], sizes = [1, 16], strides = [1, 1]} : vector<4x16xf32> to vector<1x16xf32>
    %26 = vector.broadcast %24 : vector<16x1xf32> to vector<16x16xf32>
    %27 = vector.broadcast %25 : vector<1x16xf32> to vector<16x16xf32>
    %28 = arith.addf %26, %27 : vector<16x16xf32>
    %29 = vector.extract_strided_slice %12 {offsets = [0, 3], sizes = [16, 1], strides = [1, 1]} : vector<16x4xf32> to vector<16x1xf32>
    %30 = vector.extract_strided_slice %13 {offsets = [3, 0], sizes = [1, 16], strides = [1, 1]} : vector<4x16xf32> to vector<1x16xf32>
    %31 = vector.broadcast %29 : vector<16x1xf32> to vector<16x16xf32>
    %32 = vector.broadcast %30 : vector<1x16xf32> to vector<16x16xf32>
    %33 = arith.addf %31, %32 : vector<16x16xf32>
    %34 = tpu.concatenate %18, %23, %28, %33 in 0 : vector<16x16xf32>, vector<16x16xf32>, vector<16x16xf32>, vector<16x16xf32> -> vector<64x16xf32>
    %cst_14 = arith.constant 0.000000e+00 : f32
    %35 = vector.broadcast %cst_14 : f32 to vector<64x16xf32>
    %36 = arith.cmpf ogt, %34, %35 : vector<64x16xf32>
    %cst_15 = arith.constant 2.000000e-01 : f32
    %37 = vector.broadcast %cst_15 : f32 to vector<64x16xf32>
    %38 = arith.mulf %37, %34 : vector<64x16xf32>
    %39 = arith.select %36, %34, %38 : vector<64x16xi1>, vector<64x16xf32>
    %40 = arith.addf %39, %2 : vector<64x16xf32>
    %cst_16 = arith.constant dense<0xFF800000> : vector<64xf32>
    %41 = vector.multi_reduction <maximumf>, %40, %cst_16 [1] : vector<64x16xf32> to vector<64xf32>
    %42 = vector.shape_cast %41 : vector<64xf32> to vector<64x1xf32>
    %43 = vector.broadcast %42 : vector<64x1xf32> to vector<64x16xf32>
    %44 = arith.subf %40, %43 : vector<64x16xf32>
    %45 = math.exp %44 : vector<64x16xf32>
    %cst_17 = arith.constant dense<0.000000e+00> : vector<64xf32>
    %46 = vector.multi_reduction <add>, %45, %cst_17 [1] : vector<64x16xf32> to vector<64xf32>
    %47 = vector.shape_cast %46 : vector<64xf32> to vector<64x1xf32>
    %48 = tpu.reciprocal %47 {approx = true} : vector<64x1xf32> -> vector<64x1xf32>
    %49 = vector.broadcast %48 : vector<64x1xf32> to vector<64x16xf32>
    %50 = arith.mulf %45, %49 : vector<64x16xf32>
    %cst_18 = arith.constant dense<0.000000e+00> : vector<64x16xf32>
    %51 = tpu.matmul %50, %0, %cst_18 {dimension_numbers = #tpu.dot_dimension_numbers<[1], [0], [0], [1], [0, 0, 1, 1], [], []>} : vector<64x16xf32>, vector<16x16xf32>, vector<64x16xf32> -> vector<64x16xf32>
    %52 = vector.extract_strided_slice %51 {offsets = [0, 0], sizes = [16, 16], strides = [1, 1]} : vector<64x16xf32> to vector<16x16xf32>
    %53 = vector.extract_strided_slice %51 {offsets = [16, 0], sizes = [16, 16], strides = [1, 1]} : vector<64x16xf32> to vector<16x16xf32>
    %54 = vector.extract_strided_slice %51 {offsets = [32, 0], sizes = [16, 16], strides = [1, 1]} : vector<64x16xf32> to vector<16x16xf32>
    %55 = vector.extract_strided_slice %51 {offsets = [48, 0], sizes = [16, 16], strides = [1, 1]} : vector<64x16xf32> to vector<16x16xf32>
    %56 = tpu.concatenate %52, %53, %54, %55 in 1 : vector<16x16xf32>, vector<16x16xf32>, vector<16x16xf32>, vector<16x16xf32> -> vector<16x64xf32>
    %cst_19 = arith.constant dense<0.000000e+00> : vector<16x64xf32>
    %57 = tpu.matmul %56, %3, %cst_19 {dimension_numbers = #tpu.dot_dimension_numbers<[1], [0], [0], [1], [0, 0, 1, 1], [], []>} : vector<16x64xf32>, vector<64x64xf32>, vector<16x64xf32> -> vector<16x64xf32>
    %cst_20 = arith.constant 0.000000e+00 : f32
    %58 = vector.broadcast %cst_20 : f32 to vector<16x64xf32>
    %59 = arith.cmpf ogt, %57, %58 : vector<16x64xf32>
    %cst_21 = arith.constant 0.000000e+00 : f32
    %60 = vector.broadcast %cst_21 : f32 to vector<16x64xf32>
    %61 = arith.minimumf %57, %60 : vector<16x64xf32>
    %62 = math.exp %61 : vector<16x64xf32>
    %cst_22 = arith.constant 1.000000e+00 : f32
    %63 = vector.broadcast %cst_22 : f32 to vector<16x64xf32>
    %64 = arith.subf %62, %63 : vector<16x64xf32>
    %65 = arith.select %59, %57, %64 : vector<16x64xi1>, vector<16x64xf32>
    %cst_23 = arith.constant dense<0.000000e+00> : vector<16x64xf32>
    %66 = tpu.matmul %65, %4, %cst_23 {dimension_numbers = #tpu.dot_dimension_numbers<[1], [0], [0], [1], [0, 0, 1, 1], [], []>} : vector<16x64xf32>, vector<64x64xf32>, vector<16x64xf32> -> vector<16x64xf32>
    %c0_24 = arith.constant 0 : index
    %c0_25 = arith.constant 0 : index
    %67 = vector.load %arg0[%c0_24, %c0_25] : memref<8x2xi32, #tpu.memory_space<vmem>>, vector<8x2xi32>
    %68 = tpu.iota {dimensions = array<i32: 1>} : vector<8x16xi32>
    %69 = vector.extract_strided_slice %67 {offsets = [0, 0], sizes = [8, 1], strides = [1, 1]} : vector<8x2xi32> to vector<8x1xi32>
    %c1_i32 = arith.constant 1 : i32
    %70 = vector.broadcast %c1_i32 : i32 to vector<8x1xi32>
    %71 = arith.subi %69, %70 : vector<8x1xi32>
    %c8_i32 = arith.constant 8 : i32
    %72 = vector.broadcast %c8_i32 : i32 to vector<8x1xi32>
    %73 = arith.addi %71, %72 : vector<8x1xi32>
    %74 = vector.broadcast %73 : vector<8x1xi32> to vector<8x16xi32>
    %75 = arith.cmpi eq, %68, %74 : vector<8x16xi32>
    %76 = arith.extui %75 : vector<8x16xi1> to vector<8x16xi32>
    %77 = arith.sitofp %76 : vector<8x16xi32> to vector<8x16xf32>
    %78 = vector.extract_strided_slice %67 {offsets = [0, 1], sizes = [8, 1], strides = [1, 1]} : vector<8x2xi32> to vector<8x1xi32>
    %c1_i32_26 = arith.constant 1 : i32
    %79 = vector.broadcast %c1_i32_26 : i32 to vector<8x1xi32>
    %80 = arith.subi %78, %79 : vector<8x1xi32>
    %81 = vector.broadcast %80 : vector<8x1xi32> to vector<8x16xi32>
    %82 = arith.cmpi eq, %68, %81 : vector<8x16xi32>
    %83 = arith.extui %82 : vector<8x16xi1> to vector<8x16xi32>
    %84 = arith.sitofp %83 : vector<8x16xi32> to vector<8x16xf32>
    %85 = vector.extract_strided_slice %66 {offsets = [0, 0], sizes = [16, 32], strides = [1, 1]} : vector<16x64xf32> to vector<16x32xf32>
    %cst_27 = arith.constant dense<0.000000e+00> : vector<8x32xf32>
    %86 = tpu.matmul %77, %85, %cst_27 {dimension_numbers = #tpu.dot_dimension_numbers<[1], [0], [0], [1], [0, 0, 1, 1], [], []>} : vector<8x16xf32>, vector<16x32xf32>, vector<8x32xf32> -> vector<8x32xf32>
    %87 = vector.extract_strided_slice %66 {offsets = [0, 32], sizes = [16, 32], strides = [1, 1]} : vector<16x64xf32> to vector<16x32xf32>
    %cst_28 = arith.constant dense<0.000000e+00> : vector<8x32xf32>
    %88 = tpu.matmul %84, %87, %cst_28 {dimension_numbers = #tpu.dot_dimension_numbers<[1], [0], [0], [1], [0, 0, 1, 1], [], []>} : vector<8x16xf32>, vector<16x32xf32>, vector<8x32xf32> -> vector<8x32xf32>
    %89 = arith.addf %86, %88 : vector<8x32xf32>
    %90 = vector.broadcast %9 : vector<1x32xf32> to vector<8x32xf32>
    %91 = arith.addf %89, %90 : vector<8x32xf32>
    %cst_29 = arith.constant 0.000000e+00 : f32
    %92 = vector.broadcast %cst_29 : f32 to vector<8x32xf32>
    %93 = arith.maximumf %91, %92 : vector<8x32xf32>
    %cst_30 = arith.constant dense<0.000000e+00> : vector<8x16xf32>
    %94 = tpu.matmul %93, %7, %cst_30 {dimension_numbers = #tpu.dot_dimension_numbers<[1], [0], [0], [1], [0, 0, 1, 1], [], []>} : vector<8x32xf32>, vector<32x16xf32>, vector<8x16xf32> -> vector<8x16xf32>
    %95 = vector.broadcast %10 : vector<1x16xf32> to vector<8x16xf32>
    %96 = arith.addf %94, %95 : vector<8x16xf32>
    %cst_31 = arith.constant 0.000000e+00 : f32
    %97 = vector.broadcast %cst_31 : f32 to vector<8x16xf32>
    %98 = arith.maximumf %96, %97 : vector<8x16xf32>
    %cst_32 = arith.constant dense<0.000000e+00> : vector<8x1xf32>
    %99 = tpu.matmul %98, %8, %cst_32 {dimension_numbers = #tpu.dot_dimension_numbers<[1], [0], [0], [1], [0, 0, 1, 1], [], []>} : vector<8x16xf32>, vector<16x1xf32>, vector<8x1xf32> -> vector<8x1xf32>
    %100 = vector.broadcast %11 : vector<1x1xf32> to vector<8x1xf32>
    %101 = arith.addf %99, %100 : vector<8x1xf32>
    %cst_33 = arith.constant 0.000000e+00 : f32
    %102 = vector.broadcast %cst_33 : f32 to vector<8x1xf32>
    %103 = arith.subf %102, %101 : vector<8x1xf32>
    %104 = math.exp %103 : vector<8x1xf32>
    %cst_34 = arith.constant 1.000000e+00 : f32
    %105 = vector.broadcast %cst_34 : f32 to vector<8x1xf32>
    %106 = arith.addf %105, %104 : vector<8x1xf32>
    %107 = tpu.reciprocal %106 {approx = true} : vector<8x1xf32> -> vector<8x1xf32>
    %c0_35 = arith.constant 0 : index
    %c0_36 = arith.constant 0 : index
    %108 = vector.load %arg3[%c0_35, %c0_36] : memref<8x1xf32, #tpu.memory_space<vmem>>, vector<8x1xf32>
    tpu.vector_store %arg3[%c0_35, %c0_36], %107 {strides = array<i32>} : memref<8x1xf32, #tpu.memory_space<vmem>>, vector<8x1xf32>,
    return
  }
}

</mosaic_0001>

<bundles_post_ra>
// kernel: ancnmda_forward.1
= control target key start
LH: loop header
LB: loop body
LE: loop exit
PB: predicated region body
PF: predicated region fallthrough
CT: control target
= control target key end

     0   :  { %v666_v2 = vmov 3   ;;  %v667_v3 = vmov 2   ;;  %vm54_vm0 = vcmask 130048   ;;  %v668_v7 = vmov 1   ;;  %s671_s15 = smov 32   ;;  %s672_s16 = smov 48   ;;  %s888_s2 = inlined_call_operand.vmem [shape: f32[224,64], index: 2, kind: input, shape index: {}]   ;;  %s889_s1 = inlined_call_operand.vmem [shape: f32[96,16], index: 1, kind: input, shape index: {}]   ;;  %s890_s0 = inlined_call_operand.vmem [shape: s32[8,2], index: 0, kind: input, shape index: {}]   ;;  %s891_s3 = inlined_call_operand.vmem [shape: f32[8,1], index: 3, kind: output, shape index: {}]  }
   0x1   :  { %v43_v0 = vld [vmem:[%s888_s2 + $0x88] sm:$0xff]  ;;  %v42_v1 = vld [vmem:[%s888_s2 + $0x80] sm:$0xff]  ;;  %614 = vset.pattern.permute.xlu2 %v666_v2  ;;  %613 = vset.pattern.permute.xlu1 %v667_v3  ;;  %v17_v6 = vld [vmem:[%s889_s1 + $0x18] sm:$0xff]  ;;  %v669_v12 = vmov 0   ;;  %vm364_vm9 = vcmask 261120   ;;  %vm367_vm10 = vcmask 392192  }
   0x2   :  { %75 = vmatpush.msra.mxu0 %v43_v0  ;;  %v14_v4 = vld [vmem:[%s889_s1] sm:$0xff]  ;;  %599 = vmatpush.msra.mxu1 %v43_v0  ;;  %v15_v5 = vld [vmem:[%s889_s1 + $0x8] sm:$0xff]  ;;  %v16_v8 = vld [vmem:[%s889_s1 + $0x10] sm:$0xff]  ;;  %vm370_vm11 = vcmask 523264   ;;  %s673_s22 = smov 96  }
   0x3   :  { %612 = vset.pattern.permute.xlu0 %v668_v7  ;;  %601 = vmatpush.msra.mxu2 %v15_v5  ;;  %v44_v9 = vld [vmem:[%s888_s2 + $0x90] sm:$0xf]  ;;  %v22_v21 = vld [vmem:[%s889_s1 + $0x40] sm:$0xff]  ;;  %v23_v38 = vld [vmem:[%s889_s1 + $0x48] sm:$0xff] }
   0x4   :  { %76 = vmatpush.msra.mxu0 %v42_v1  ;;  %600 = vmatpush.msra.mxu1 %v42_v1  ;;  %v20_v23 = vld [vmem:[%s889_s1 + $0x30] sm:$0xff]  ;;  %v21_v40 = vld [vmem:[%s889_s1 + $0x38] sm:$0xff] }
   0x5   :  { %575 = vmatmul.msk.f32.vlgmr.msra.gmra.mxu0 %vm54_vm0, %v14_v4  ;;  %576 = vmatmul.msk.f32.vlgmr.msra.gmra.mxu1 %vm54_vm0, %v15_v5  ;;  %v24_v50 = vld [vmem:[%s889_s1 + $0x50] sm:$0xff]  ;;  %v25_v55 = vld [vmem:[%s889_s1 + $0x58] sm:$0xff] }
   0x6   :  { %101 = vmatpush.msrb.mxu1 %v17_v6  ;;  %602 = vmatpush.msra.mxu2 %v14_v4 }
   0x7   :  { %311 = vmatpush.msrb.mxu0 %v15_v5 }
   0x8   :  { %102 = vmatpush.msrb.mxu1 %v16_v8 }
   0x9   :  { %312 = vmatpush.msrb.mxu0 %v14_v4 }
   0xd   :  { %577 = vmatmul.msk.f32.vlgmr.msrb.gmra.mxu1 %vm54_vm0, %v44_v9 }
  0x82   :  { %v720_v10 = vpop.f32.mrf.mxu0  ;;  %v725_v11 = vpop.f32.mrf.mxu1 }
  0x83   :  { %143 = vperm.xlu2 %614, %v720_v10   ;;  %132 = vperm.xlu1 %613, %v720_v10  }
  0x84   :  { %121 = vperm.xlu0 %612, %v720_v10  }
  0x8a   :  { %v730_v13 = vpop.f32.mrf.mxu1 }
  0x8b   :  { %147 = vperm.xlu2 %614, %v725_v11   ;;  %136 = vperm.xlu1 %613, %v725_v11   ;;  %v139_v14 = vperm.slane %v730_v13, 2  ;;  %v128_v15 = vperm.slane %v730_v13, 1  ;;  %v150_v26 = vperm.slane %v730_v13, 3 }
  0x8c   :  { %125 = vperm.xlu0 %612, %v725_v11  }
  0x93   :  { %616 = vset.pattern.permute.xlu2 %v669_v12 }
  0x94   :  { %615 = vset.pattern.permute.xlu0 %v669_v12  ;;  %v117_v12 = vperm.slane %v730_v13, 0 }
  0xdd   :  { %v144_v24 = vpop.permute.xlu2 %143 }
  0xde   :  { %v151_v35 = vadd.f32 %v150_v26, %v144_v24 }
  0xe0   :  { %v167_v42 = vmul.f32 0.2, %v151_v35  ;;  %vm159_vm5 = vcmp.gt.f32.partialorder %v151_v35, 0.0 }
  0xe2   :  { %v175_v51 = vsel %vm159_vm5, %v151_v35, %v167_v42 }
  0xe3   :  { %v183_v52 = vadd.f32 %v175_v51, %v24_v50 }
  0xe5   :  { %v148_v45 = vpop.permute.xlu2 %147  ;;  %v203_v54 = vsel %vm54_vm0, %v183_v52, -inf }
  0xe6   :  { %v152_v49 = vadd.f32 %v150_v26, %v148_v45 }
  0xe8   :  { %v168_v53 = vmul.f32 0.2, %v152_v49  ;;  %vm160_vm6 = vcmp.gt.f32.partialorder %v152_v49, 0.0 }
  0xea   :  { %v176_v56 = vsel %vm160_vm6, %v152_v49, %v168_v53 }
  0xeb   :  { %v184_v57 = vadd.f32 %v176_v56, %v25_v55 }
  0xed   :  { %v206_v58 = vsel %vm54_vm0, %v184_v57, -inf }
  0xf5   :  { %v133_v16 = vpop.permute.xlu1 %132 }
  0xf6   :  { %v140_v17 = vadd.f32 %v139_v14, %v133_v16  ;;  %v122_v18 = vpop.permute.xlu0 %121 }
  0xf7   :  { %v129_v19 = vadd.f32 %v128_v15, %v122_v18 }
  0xf8   :  { %vm157_vm1 = vcmp.gt.f32.partialorder %v140_v17, 0.0  ;;  %v165_v20 = vmul.f32 0.2, %v140_v17 }
  0xf9   :  { %vm155_vm2 = vcmp.gt.f32.partialorder %v129_v19, 0.0  ;;  %v163_v22 = vmul.f32 0.2, %v129_v19 }
  0xfa   :  { %v173_v25 = vsel %vm157_vm1, %v140_v17, %v165_v20  ;;  %vm569_vm1 = vcmask 7168  }
  0xfb   :  { %v181_v27 = vadd.f32 %v173_v25, %v22_v21  ;;  %v171_v28 = vsel %vm155_vm2, %v129_v19, %v163_v22 }
  0xfc   :  { %v179_v29 = vadd.f32 %v171_v28, %v20_v23  ;;  %v18_v23 = vld [vmem:[%s889_s1 + $0x20] sm:$0xff]  ;;  %v19_v28 = vld [vmem:[%s889_s1 + $0x28] sm:$0xff]  ;;  %s670_s1 = smov 16  }
  0xfd   :  { %v137_v30 = vpop.permute.xlu1 %136  ;;  %v197_v31 = vsel %vm54_vm0, %v181_v27, -inf }
  0xfe   :  { %v141_v32 = vadd.f32 %v139_v14, %v137_v30  ;;  %v126_v33 = vpop.permute.xlu0 %125  ;;  %198 = vmax.xlane.f32.xlu2 %v197_v31  ;;  %v191_v34 = vsel %vm54_vm0, %v179_v29, -inf }
  0xff   :  { %v130_v36 = vadd.f32 %v128_v15, %v126_v33  ;;  %192 = vmax.xlane.f32.xlu0 %v191_v34 }
 0x100   :  { %vm158_vm3 = vcmp.gt.f32.partialorder %v141_v32, 0.0  ;;  %v166_v37 = vmul.f32 0.2, %v141_v32 }
 0x101   :  { %vm156_vm4 = vcmp.gt.f32.partialorder %v130_v36, 0.0  ;;  %v164_v39 = vmul.f32 0.2, %v130_v36 }
 0x102   :  { %v174_v41 = vsel %vm158_vm3, %v141_v32, %v166_v37 }
 0x103   :  { %v182_v43 = vadd.f32 %v174_v41, %v23_v38  ;;  %v172_v44 = vsel %vm156_vm4, %v130_v36, %v164_v39 }
 0x104   :  { %v180_v46 = vadd.f32 %v172_v44, %v21_v40 }
 0x105   :  { %v200_v47 = vsel %vm54_vm0, %v182_v43, -inf }
 0x106   :  { %201 = vmax.xlane.f32.xlu2 %v200_v47  ;;  %v194_v48 = vsel %vm54_vm0, %v180_v46, -inf }
 0x107   :  { %195 = vmax.xlane.f32.xlu1 %v194_v48 }
 0x10f   :  { %204 = vmax.xlane.f32.xlu1 %v203_v54 }
 0x113   :  { %109 = vperm.xlu0 %615, %v720_v10  }
 0x117   :  { %207 = vmax.xlane.f32.xlu1 %v206_v58 }
 0x11b   :  { %622 = vset.pattern.permute.xlu0 %v668_v7 }
 0x11e   :  { %114 = vperm.xlu2 %616, %v725_v11  }
 0x171   :  { %v199_v59 = vpop.xlane.xlu2 %198 }
 0x172   :  { %v213_v60 = vsub.f32 %v181_v27, %v199_v59  ;;  %v193_v61 = vpop.xlane.xlu0 %192 }
 0x173   :  { %v211_v62 = vsub.f32 %v179_v29, %v193_v61 }
 0x174   :  { %v225_v63 = vmul.f32 1.442695, %v213_v60 }
 0x175   :  { %v221_v0 = vmul.f32 1.442695, %v211_v62 }
 0x176   :  { %626 = vpow2.f32 %v225_v63 }
 0x177   :  { %628 = vpow2.f32 %v221_v0 }
 0x179   :  { %v202_v1 = vpop.xlane.xlu2 %201 }
 0x17a   :  { %v214_v2 = vsub.f32 %v182_v43, %v202_v1  ;;  %v196_v3 = vpop.xlane.xlu1 %195 }
 0x17b   :  { %v212_v4 = vsub.f32 %v180_v46, %v196_v3 }
 0x17c   :  { %v762_v5 = vpop.eup %626  ;;  %v227_v6 = vmul.f32 1.442695, %v214_v2 }
 0x17d   :  { %v629_v8 = vpop.eup %628  ;;  %v223_v9 = vmul.f32 1.442695, %v212_v4  ;;  %v245_v7 = vsel %vm54_vm0, %v762_v5, 0.0 }
 0x17e   :  { %630 = vpow2.f32 %v227_v6  ;;  %246 = vadd.xlane.f32.xlu2 %v245_v7  ;;  %v239_v10 = vsel %vm54_vm0, %v629_v8, 0.0 }
 0x17f   :  { %632 = vpow2.f32 %v223_v9  ;;  %240 = vadd.xlane.f32.xlu1 %v239_v10 }
 0x181   :  { %v115_v14 = vpop.permute.xlu2 %114 }
 0x182   :  { %v119_v20 = vadd.f32 %v117_v12, %v115_v14  ;;  %v205_v21 = vpop.xlane.xlu1 %204 }
 0x183   :  { %v215_v26 = vsub.f32 %v183_v52, %v205_v21  ;;  %v32_v21 = vld [vmem:[%s888_s2 + $0x30] sm:$0xff] }
 0x184   :  { %v767_v11 = vpop.eup %630  ;;  %v162_v24 = vmul.f32 0.2, %v119_v20  ;;  %vm154_vm8 = vcmp.gt.f32.partialorder %v119_v20, 0.0 }
 0x185   :  { %v633_v15 = vpop.eup %632  ;;  %v110_v16 = vpop.permute.xlu0 %109  ;;  %v248_v17 = vsel %vm54_vm0, %v767_v11, 0.0  ;;  %v229_v30 = vmul.f32 1.442695, %v215_v26  ;;  %v26_v26 = vld [vmem:[%s888_s2] sm:$0xff] }
 0x186   :  { %v118_v18 = vadd.f32 %v117_v12, %v110_v16  ;;  %249 = vadd.xlane.f32.xlu0 %v248_v17  ;;  %v242_v19 = vsel %vm54_vm0, %v633_v15, 0.0  ;;  %v170_v29 = vsel %vm154_vm8, %v119_v20, %v162_v24  ;;  %v441_v16 = vld [vmem:[%s890_s0] sm:$0xff]  ;;  %v33_v20 = vld [vmem:[%s888_s2 + $0x38] sm:$0xff]  ;;  %v28_v24 = vld [vmem:[%s888_s2 + $0x10] sm:$0xff] }
 0x187   :  { %243 = vadd.xlane.f32.xlu1 %v242_v19  ;;  %v178_v32 = vadd.f32 %v170_v29, %v19_v28  ;;  %634 = vpow2.f32 %v229_v30  ;;  %385 = vmatpush.msra.mxu3 %v33_v20 }
 0x188   :  { %vm153_vm7 = vcmp.gt.f32.partialorder %v118_v18, 0.0  ;;  %v161_v22 = vmul.f32 0.2, %v118_v18 }
 0x189   :  { %v188_v34 = vsel %vm54_vm0, %v178_v32, -inf  ;;  %386 = vmatpush.msra.mxu3 %v32_v21 }
 0x18a   :  { %v169_v13 = vsel %vm153_vm7, %v118_v18, %v161_v22  ;;  %v208_v31 = vpop.xlane.xlu1 %207  ;;  %v592_v18 = vadd.s32 4294967295, %v441_v16  ;;  %v31_v22 = vld [vmem:[%s888_s2 + $0x28] sm:$0xff] }
 0x18b   :  { %v177_v25 = vadd.f32 %v169_v13, %v18_v23  ;;  %v216_v33 = vsub.f32 %v184_v57, %v208_v31  ;;  %387 = vmatpush.msra.mxu3 %v31_v22  ;;  %v30_v23 = vld [vmem:[%s888_s2 + $0x20] sm:$0xff]  ;;  %v29_v13 = vld [vmem:[%s888_s2 + $0x18] sm:$0xff] }
 0x18c   :  { %v445_v19 = vadd.s32 8, %v592_v18  ;;  %v49_v22 = vld [vmem:[%s888_s2 + $0xb8] sm:$0xff] }
 0x18d   :  { %v185_v27 = vsel %vm54_vm0, %v177_v25, -inf  ;;  %v231_v35 = vmul.f32 1.442695, %v216_v33  ;;  %v635_v36 = vpop.eup %634  ;;  %388 = vmatpush.msra.mxu3 %v30_v23  ;;  %v624_v23 = vld [vmem:[%s888_s2 + $0xd0] ss:$0 sm:$0xff] }
 0x18e   :  { %v251_v37 = vsel %vm54_vm0, %v635_v36, 0.0 }
 0x18f   :  { %186 = vmax.xlane.f32.xlu1 %v185_v27  ;;  %636 = vpow2.f32 %v231_v35  ;;  %389 = vmatpush.msra.mxu3 %v29_v13 }
 0x191   :  { %390 = vmatpush.msra.mxu3 %v28_v24 }
 0x195   :  { %v637_v38 = vpop.eup %636 }
 0x196   :  { %v254_v39 = vsel %vm54_vm0, %v637_v38, 0.0 }
 0x197   :  { %189 = vmax.xlane.f32.xlu1 %v188_v34 }
 0x19f   :  { %252 = vadd.xlane.f32.xlu1 %v251_v37 }
 0x1a7   :  { %255 = vadd.xlane.f32.xlu1 %v254_v39 }
 0x1f1   :  { %v247_v44 = vpop.xlane.xlu2 %246 }
 0x1f2   :  { %v241_v40 = vpop.xlane.xlu1 %240 }
 0x1f3   :  { %638 = vrcp.f32 %v241_v40 }
 0x1f9   :  { %v639_v41 = vpop.eup %638  ;;  %v250_v50 = vpop.xlane.xlu0 %249 }
 0x1fa   :  { %v244_v42 = vpop.xlane.xlu1 %243  ;;  %v267_v43 = vmul.f32 %v639_v41, %v629_v8  ;;  %v41_v41 = vld [vmem:[%s888_s2 + $0x78] sm:$0xff] }
 0x1fb   :  { %640 = vrcp.f32 %v244_v42  ;;  %426 = vmatpush.msra.mxu0 %v41_v41  ;;  %v40_v42 = vld [vmem:[%s888_s2 + $0x70] sm:$0xff] }
 0x1fc   :  { %580 = vmatmul.msk.f32.vlgmr.msra.gmra.mxu2 %vm54_vm0, %v267_v43  ;;  %642 = vrcp.f32 %v247_v44  ;;  %v39_v43 = vld [vmem:[%s888_s2 + $0x68] sm:$0xff]  ;;  %v38_v44 = vld [vmem:[%s888_s2 + $0x60] sm:$0xff] }
 0x1fd   :  { %427 = vmatpush.msra.mxu0 %v40_v42 }
 0x1ff   :  { %428 = vmatpush.msra.mxu0 %v39_v43 }
 0x201   :  { %v641_v45 = vpop.eup %640  ;;  %429 = vmatpush.msra.mxu0 %v38_v44 }
 0x202   :  { %v187_v46 = vpop.xlane.xlu1 %186  ;;  %v268_v47 = vmul.f32 %v641_v45, %v633_v15  ;;  %v643_v51 = vpop.eup %642  ;;  %v37_v45 = vld [vmem:[%s888_s2 + $0x58] sm:$0xff] }
 0x203   :  { %v209_v48 = vsub.f32 %v177_v25, %v187_v46  ;;  %v269_v53 = vmul.f32 %v643_v51, %v762_v5  ;;  %v27_v25 = vld [vmem:[%s888_s2 + $0x8] sm:$0xff]  ;;  %430 = vmatpush.msra.mxu0 %v37_v45  ;;  %v36_v46 = vld [vmem:[%s888_s2 + $0x50] sm:$0xff] }
 0x204   :  { %581 = vmatmul.msk.f32.gmra.mxu2 %vm54_vm0, %v268_v47  ;;  %391 = vmatpush.msra.mxu3 %v27_v25  ;;  %v35_v47 = vld [vmem:[%s888_s2 + $0x48] sm:$0xff] }
 0x205   :  { %v217_v49 = vmul.f32 1.442695, %v209_v48  ;;  %431 = vmatpush.msra.mxu0 %v36_v46  ;;  %v34_v48 = vld [vmem:[%s888_s2 + $0x40] sm:$0xff] }
 0x206   :  { %392 = vmatpush.msra.mxu3 %v26_v26  ;;  %v625_v26 = vld [vmem:[%s888_s2 + $0xd8] ss:$0 sm:$0xff] }
 0x207   :  { %644 = vpow2.f32 %v217_v49  ;;  %432 = vmatpush.msra.mxu0 %v35_v47 }
 0x208   :  { %646 = vrcp.f32 %v250_v50 }
 0x209   :  { %433 = vmatpush.msra.mxu0 %v34_v48 }
 0x20a   :  { %v190_v52 = vpop.xlane.xlu1 %189 }
 0x20b   :  { %v210_v54 = vsub.f32 %v178_v32, %v190_v52 }
 0x20c   :  { %582 = vmatmul.msk.f32.gmra.mxu2 %vm54_vm0, %v269_v53 }
 0x20d   :  { %v645_v55 = vpop.eup %644  ;;  %v219_v56 = vmul.f32 1.442695, %v210_v54 }
 0x20e   :  { %v233_v57 = vsel %vm54_vm0, %v645_v55, 0.0  ;;  %v647_v58 = vpop.eup %646 }
 0x20f   :  { %648 = vpow2.f32 %v219_v56  ;;  %234 = vadd.xlane.f32.xlu1 %v233_v57  ;;  %v270_v60 = vmul.f32 %v647_v58, %v767_v11 }
 0x212   :  { %v253_v59 = vpop.xlane.xlu1 %252 }
 0x213   :  { %650 = vrcp.f32 %v253_v59 }
 0x214   :  { %583 = vmatmul.msk.f32.gmra.mxu2 %vm54_vm0, %v270_v60 }
 0x215   :  { %v649_v61 = vpop.eup %648 }
 0x216   :  { %v236_v62 = vsel %vm54_vm0, %v649_v61, 0.0 }
 0x217   :  { %237 = vadd.xlane.f32.xlu1 %v236_v62 }
 0x219   :  { %v651_v63 = vpop.eup %650 }
 0x21a   :  { %v256_v0 = vpop.xlane.xlu1 %255  ;;  %v271_v1 = vmul.f32 %v651_v63, %v635_v36 }
 0x21b   :  { %652 = vrcp.f32 %v256_v0  ;;  %v442_v0 = vlaneseq }
 0x21c   :  { %584 = vmatmul.msk.f32.gmra.mxu2 %vm54_vm0, %v271_v1 }
 0x221   :  { %v653_v2 = vpop.eup %652 }
 0x222   :  { %v272_v3 = vmul.f32 %v653_v2, %v637_v38  ;;  %v443_v2 = vand.u32 127, %v442_v0 }
 0x224   :  { %585 = vmatmul.msk.f32.gmra.mxu2 %vm54_vm0, %v272_v3 }
 0x27f   :  { %v320_v4 = vpop.f32.mrf.mxu2 }
 0x280   :  { %340 = vrot.lane.b32.xlu2 %v320_v4, %s670_s1 }
 0x282   :  { %v235_v5 = vpop.xlane.xlu1 %234 }
 0x283   :  { %654 = vrcp.f32 %v235_v5 }
 0x287   :  { %v323_v6 = vpop.f32.mrf.mxu2 }
 0x288   :  { %342 = vrot.lane.b32.xlu2 %v323_v6, %s670_s1  ;;  %v674_v6 = vmov 0.0  }
 0x289   :  { %v655_v8 = vpop.eup %654 }
 0x28a   :  { %v238_v9 = vpop.xlane.xlu1 %237  ;;  %v265_v7 = vmul.f32 %v655_v8, %v645_v55 }
 0x28b   :  { %656 = vrcp.f32 %v238_v9 }
 0x28c   :  { %578 = vmatmul.msk.f32.vlgmr.msrb.gmra.mxu0 %vm54_vm0, %v265_v7 }
 0x28f   :  { %v326_v10 = vpop.f32.mrf.mxu2 }
 0x290   :  { %348 = vrot.lane.b32.xlu1 %v326_v10, %s671_s15  ;;  %v48_v10 = vld [vmem:[%s888_s2 + $0xb0] sm:$0xff] }
 0x291   :  { %v657_v11 = vpop.eup %656 }
 0x292   :  { %v266_v12 = vmul.f32 %v657_v11, %v649_v61  ;;  %v47_v11 = vld [vmem:[%s888_s2 + $0xa8] sm:$0xff] }
 0x294   :  { %579 = vmatmul.msk.f32.gmra.mxu0 %vm54_vm0, %v266_v12  ;;  %v46_v12 = vld [vmem:[%s888_s2 + $0xa0] sm:$0xff] }
 0x297   :  { %v329_v14 = vpop.f32.mrf.mxu2 }
 0x29f   :  { %v332_v15 = vpop.f32.mrf.mxu2 }
 0x2a0   :  { %356 = vrot.lane.b32.xlu0 %v332_v15, %s672_s16  ;;  %v50_v15 = vld [vmem:[%s888_s2 + $0xc0] sm:$0xff] }
 0x2a1   :  { %558 = vmatpush.msrb.mxu3 %v50_v15 }
 0x2a3   :  { %559 = vmatpush.msrb.mxu3 %v49_v22 }
 0x2a7   :  { %v335_v17 = vpop.f32.mrf.mxu2 }
 0x2a8   :  { %350 = vrot.lane.b32.xlu0 %v329_v14, %s671_s15  ;;  %358 = vrot.lane.b32.xlu2 %v335_v17, %s672_s16  ;;  %v45_v14 = vld [vmem:[%s888_s2 + $0x98] sm:$0xff]  ;;  %v623_v17 = vld [vmem:[%s888_s2 + $0xc8] ss:$0 sm:$0xff] }
 0x2b0   :  { %447 = vperm.xlu2 %616, %v445_v19   ;;  %453 = vperm.xlu0 %622, %v592_v18  }
 0x2da   :  { %v341_v27 = vpop.permute.xlu2 %340 }
 0x2e2   :  { %v343_v33 = vpop.permute.xlu2 %342 }
 0x302   :  { %v349_v30 = vpop.permute.xlu1 %348  ;;  %v359_v38 = vpop.permute.xlu2 %358 }
 0x309   :  { %v314_v28 = vpop.f32.mrf.mxu0 }
 0x30a   :  { %v362_v29 = vsel %vm54_vm0, %v314_v28, %v341_v27  ;;  %v448_v9 = vpop.permute.xlu2 %447 }
 0x30b   :  { %v365_v32 = vsel %vm364_vm9, %v362_v29, %v349_v30  ;;  %vm449_vm15 = vcmp.eq.s32.totalorder %v443_v2, %v448_v9 }
 0x30c   :  { %v593_v7 = vsel %vm449_vm15, 1.0, %v674_v6 }
 0x311   :  { %v317_v35 = vpop.f32.mrf.mxu0 }
 0x312   :  { %v357_v31 = vpop.permute.xlu0 %356  ;;  %v363_v36 = vsel %vm54_vm0, %v317_v35, %v343_v33 }
 0x313   :  { %v368_v34 = vsel %vm367_vm10, %v365_v32, %v357_v31 }
 0x314   :  { %586 = vmatmul.msk.f32.vlgmr.msra.gmra.mxu3 %vm370_vm11, %v368_v34 }
 0x31a   :  { %v351_v37 = vpop.permute.xlu0 %350 }
 0x31b   :  { %v366_v39 = vsel %vm364_vm9, %v363_v36, %v351_v37 }
 0x31c   :  { %v369_v40 = vsel %vm367_vm10, %v366_v39, %v359_v38 }
 0x31d   :  { %587 = vmatmul.msk.f32.gmra.mxu3 %vm370_vm11, %v369_v40 }
 0x322   :  { %v454_v1 = vpop.permute.xlu0 %453 }
 0x323   :  { %vm455_vm14 = vcmp.eq.s32.totalorder %v443_v2, %v454_v1 }
 0x324   :  { %v594_v8 = vsel %vm455_vm14, 1.0, %v674_v6 }
 0x397   :  { %v394_v49 = vpop.f32.mrf.mxu3 }
 0x398   :  { %v402_v50 = vmin.f32 %v394_v49, 0.0  ;;  %vm400_vm12 = vcmp.gt.f32.partialorder %v394_v49, 0.0 }
 0x39a   :  { %v404_v51 = vmul.f32 1.442695, %v402_v50 }
 0x39c   :  { %658 = vpow2.f32 %v404_v51 }
 0x3a0   :  { %v397_v52 = vpop.f32.mrf.mxu3 }
 0x3a1   :  { %v403_v53 = vmin.f32 %v397_v52, 0.0  ;;  %vm401_vm13 = vcmp.gt.f32.partialorder %v397_v52, 0.0 }
 0x3a2   :  { %v659_v54 = vpop.eup %658 }
 0x3a3   :  { %v588_v55 = vadd.f32 -1.0, %v659_v54  ;;  %v406_v56 = vmul.f32 1.442695, %v403_v53 }
 0x3a5   :  { %v410_v57 = vsel %vm400_vm12, %v394_v49, %v588_v55  ;;  %660 = vpow2.f32 %v406_v56 }
 0x3a6   :  { %590 = vmatmul.msk.f32.vlgmr.msra.gmra.mxu0 %vm370_vm11, %v410_v57 }
 0x3ab   :  { %v661_v58 = vpop.eup %660 }
 0x3ac   :  { %v589_v59 = vadd.f32 -1.0, %v661_v58 }
 0x3ae   :  { %v411_v60 = vsel %vm401_vm13, %v397_v52, %v589_v59 }
 0x3af   :  { %591 = vmatmul.msk.f32.gmra.mxu0 %vm370_vm11, %v411_v60 }
 0x423   :  { %v435_v61 = vpop.f32.mrf.mxu0 }
 0x42c   :  { %v438_v62 = vpop.f32.mrf.mxu0 }
 0x42d   :  { %v617_v63 = vpack.i.bf16 %v435_v61, %v438_v62 }
 0x42f   :  { %618 = vrot.lane.b32.xlu1 %v617_v63, %s673_s22 }
 0x4a1   :  { %v619_v3 = vpop.permute.xlu1 %618 }
 0x4a2   :  { %v620_v4 = vunpack.i.l.bf16 %v619_v3  ;;  %v621_v5 = vunpack.i.h.bf16 %v619_v3 }
 0x4a4   :  { %483 = vmatpush.msra.mxu1 %v620_v4 }
 0x4a6   :  { %484 = vmatpush.msra.mxu1 %v621_v5 }
 0x4a7   :  { %595 = vmatmul.msk.f32.vlgmr.msra.gmra.mxu1 %vm54_vm0, %v594_v8 }
 0x4a8   :  { %506 = vmatpush.msrb.mxu1 %v438_v62 }
 0x4aa   :  { %507 = vmatpush.msrb.mxu1 %v435_v61 }
 0x4ac   :  { %531 = vmatpush.msra.mxu1 %v48_v10 }
 0x4ae   :  { %532 = vmatpush.msra.mxu1 %v47_v11 }
 0x4af   :  { %596 = vmatmul.msk.f32.vlgmr.msrb.gmra.mxu1 %vm54_vm0, %v593_v7 }
 0x4b0   :  { %533 = vmatpush.msra.mxu1 %v46_v12 }
 0x4b2   :  { %534 = vmatpush.msra.mxu1 %v45_v14 }
 0x524   :  { %v486_v16 = vpop.f32.mrf.mxu1 }
 0x52c   :  { %v509_v18 = vpop.f32.mrf.mxu1 }
 0x52d   :  { %v510_v19 = vadd.f32 %v509_v18, %v486_v16 }
 0x52f   :  { %v513_v20 = vadd.f32 %v623_v17, %v510_v19 }
 0x531   :  { %v514_v21 = vmax.f32 %v513_v20, 0.0 }
 0x533   :  { %597 = vmatmul.msk.f32.vlgmr.msra.gmra.mxu1 %vm364_vm9, %v514_v21 }
 0x5b0   :  { %v536_v13 = vpop.f32.mrf.mxu1 }
 0x5b1   :  { %v537_v24 = vadd.f32 %v624_v23, %v536_v13 }
 0x5b3   :  { %v539_v25 = vmax.f32 %v537_v24, 0.0 }
 0x5b5   :  { %598 = vmatmul.msk.f32.vlgmr.msrb.gmra.mxu3 %vm54_vm0, %v539_v25 }
 0x638   :  { %v561_v27 = vpop.f32.mrf.mxu3 }
 0x639   :  { %v562_v28 = vadd.f32 %v625_v26, %v561_v27 }
 0x63b   :  { %v564_v29 = vsub.f32 0.0, %v562_v28 }
 0x63d   :  { %v565_v30 = vmul.f32 1.442695, %v564_v29 }
 0x63f   :  { %662 = vpow2.f32 %v565_v30 }
 0x645   :  { %v663_v31 = vpop.eup %662 }
 0x646   :  { %v567_v32 = vadd.f32 1.0, %v663_v31 }
 0x648   :  { %664 = vrcp.f32 %v567_v32 }
 0x64e   :  { %v665_v33 = vpop.eup %664 }
 0x64f   :  { %570 = vst.msk [vmem:[%s891_s3] sm:$0xff] %vm569_vm1, %v665_v33 }

</bundles_post_ra>
